<compile_context>
chip_gen: v6e
topology: v6e:2x2x1
jax: 0.10.0
libtpu: 0.0.40
codegen_flags: <defaults>
</compile_context>

<pallas_src>
import math
from functools import partial

import jax
import jax.numpy as jnp
from jax import lax
from jax.experimental import pallas as pl
from jax.experimental.pallas import tpu as pltpu


def _round_up(x, m):
    return ((x + m - 1) // m) * m


# ----------------------------- Pallas kernel ------------------------------ #
def _object_encoder_kernel(obj_ref, sig_ref, w0_ref, w2_ref, b2_ref, out_ref,
                           *, num_cats, slope):
    objs = obj_ref[...]                                   # (tm, 7) f32
    tm = objs.shape[0]
    wdt = w0_ref.dtype                                    # f32 or bf16

    # --- positional-encoding phases: one wide slab, exact f32 VPU mults --- #
    sig = sig_ref[...]                                    # (1, half) f32
    phase = jnp.concatenate(
        [objs[:, c:c + 1] * sig for c in range(1, 6)], axis=-1)   # (tm, 5*half)
    # cos(x) = sin(x + pi/2): single wide EUP sin pass over (tm, 10*half).
    phase_sc = jnp.concatenate(
        [phase, phase + jnp.float32(0.5 * math.pi)], axis=-1)
    sin_sc = jnp.sin(phase_sc)                            # (tm, 10*half) f32

    # --- one-hot category (nn.Embedding folded into fc[0] offline) -------- #
    cat = objs[:, 0:1].astype(jnp.int32)                  # truncates like .int()
    ids = lax.broadcasted_iota(jnp.int32, (tm, num_cats), 1)
    one_hot = (ids == cat).astype(jnp.float32)

    # --- fc[0]: one fused MXU matmul (embedding + sin/cos + scalar + bias) - #
    ones = jnp.ones((tm, 1), jnp.float32)
    x = jnp.concatenate([one_hot, sin_sc, objs[:, 6:7], ones], axis=-1)
    h = jnp.dot(x.astype(wdt), w0_ref[...],
                preferred_element_type=jnp.float32)       # (tm, 2*d_model) f32

    # --- fc[1]: LeakyReLU(0.01), 2 VPU ops ---------------------------------#
    h = jnp.maximum(h, slope * h)

    # --- fc[2]: Linear(2*d_model -> d_model) ------------------------------ #
    out = jnp.dot(h.astype(wdt), w2_ref[...],
                  preferred_element_type=jnp.float32) + b2_ref[...]
    out_ref[...] = out.astype(out_ref.dtype)


# --------------------------- parameter folding ----------------------------- #
def prepare_params(raw_params, d_model, *, use_bf16=True):
    """Fold / permute the original-module parameters for the fused kernel."""
    emb_table, sigma, w1, b1, w2, b2 = raw_params
    hidden = d_model // 2
    half = hidden // 2
    num_cats = emb_table.shape[0]
    wdt = jnp.bfloat16 if use_bf16 else jnp.float32

    # Embedding folded into the first Linear.
    emb_w1 = emb_table.astype(jnp.float32) @ w1[:hidden]            # (C, 2D)

    # W1 rows regrouped to match [sin(f1..f5) | cos(f1..f5)] of phase_sc.
    sin_rows, cos_rows = [], []
    for j in range(5):
        base = hidden + j * hidden
        sin_rows.append(w1[base:base + half])
        cos_rows.append(w1[base + half:base + hidden])
    w1_sincos = jnp.concatenate(sin_rows + cos_rows, axis=0)        # (10*half, 2D)
    w1_last = w1[-1:]                                               # (1, 2D)

    # Fully fused fc[0] weight: rows = [emb_w1; w1_sincos; w1_last; b1].
    w0 = jnp.concatenate([emb_w1, w1_sincos, w1_last, b1], axis=0)  # (K, 2D)

    return dict(
        sigma=sigma.astype(jnp.float32),     # stays f32 (phase precision)
        w0=w0.astype(wdt),
        w2=w2.astype(wdt),
        b2=b2.astype(jnp.float32),
        d_model=d_model,
        num_cats=num_cats,
    )


# ------------------------------- wrapper ----------------------------------- #
def object_encoder(objs, p, *, tm=2048):
    """objs: (B, N, 7) float32. Returns (B, N, d_model) float32."""
    B, N, F_in = objs.shape
    assert F_in == 7
    assert tm % 8 == 0
    d_model = p["d_model"]

    M = B * N
    Mp = _round_up(M, 8)                      # sublane multiple
    if Mp <= 256:
        tm_eff = Mp                           # collapse small M into one step
    else:
        # at least 2 grid steps so the "parallel" axis shards across both
        # v7x TensorCores; per-step overhead (~0.35us) is amortised by big tm.
        tm_eff = min(tm, _round_up(-(-Mp // 2), 256))
        Mp = _round_up(Mp, tm_eff)
    grid = Mp // tm_eff

    objs_flat = objs.reshape(M, F_in).astype(jnp.float32)
    if Mp != M:
        objs_flat = jnp.concatenate(
            [objs_flat, jnp.zeros((Mp - M, F_in), jnp.float32)], axis=0)

    kernel = partial(_object_encoder_kernel,
                     num_cats=p["num_cats"], slope=0.01)
    consts = (p["sigma"], p["w0"], p["w2"], p["b2"])

    in_specs = [pl.BlockSpec((tm_eff, F_in), lambda i: (i, 0))]
    in_specs += [pl.BlockSpec(c.shape, lambda i: (0, 0)) for c in consts]

    out = pl.pallas_call(
        kernel,
        out_shape=jax.ShapeDtypeStruct((Mp, d_model), jnp.float32),
        grid_spec=pltpu.PrefetchScalarGridSpec(
            num_scalar_prefetch=0,
            grid=(grid,),
            in_specs=in_specs,
            out_specs=pl.BlockSpec((tm_eff, d_model), lambda i: (i, 0)),
        ),
        compiler_params=pltpu.CompilerParams(
            dimension_semantics=("parallel",)),
    )(objs_flat, *consts)

    if Mp != M:
        out = out[:M]
    return out.reshape(B, N, d_model)


# -------------------------- pure-JAX references ---------------------------- #
def object_encoder_ref(objs, raw_params):
    """Faithful reference of the original module layout (f32, exact cos)."""
    emb_table, sigma, w1, b1, w2, b2 = raw_params
    cat = objs[..., 0].astype(jnp.int32)
    emb = emb_table[cat]

    def pe(x):
        return jnp.concatenate([jnp.sin(x * sigma), jnp.cos(x * sigma)], axis=-1)

    feat = jnp.concatenate(
        [emb, pe(objs[..., 1:2]), pe(objs[..., 2:3]), pe(objs[..., 3:4]),
         pe(objs[..., 4:5]), pe(objs[..., 5:6]), objs[..., 6:7]], axis=-1)
    h = feat @ w1 + b1[0]
    h = jnp.where(h > 0, h, 0.01 * h)
    return h @ w2 + b2[0]


def object_encoder_restructured_ref(objs, p):
    """Pure-JAX mirror of the kernel's restructured math (tight check)."""
    B, N, _ = objs.shape
    d_model = p["d_model"]
    x = objs.reshape(B * N, 7).astype(jnp.float32)
    sig = p["sigma"]
    one_hot = jax.nn.one_hot(x[:, 0].astype(jnp.int32), p["num_cats"],
                             dtype=jnp.float32)
    phase = jnp.concatenate([x[:, c:c + 1] * sig for c in range(1, 6)], axis=-1)
    phase_sc = jnp.concatenate(
        [phase, phase + jnp.float32(0.5 * math.pi)], axis=-1)
    feat = jnp.concatenate(
        [one_hot, jnp.sin(phase_sc), x[:, 6:7], jnp.ones_like(x[:, :1])], axis=-1)
    h = feat @ p["w0"].astype(jnp.float32)
    h = jnp.maximum(h, 0.01 * h)
    out = h @ p["w2"].astype(jnp.float32) + p["b2"]
    return out.reshape(B, N, d_model)


# ------------------------------ param init --------------------------------- #
def init_params(key, d_model, num_obj_categories):
    hidden = d_model // 2
    half = hidden // 2
    feat_dim = 1 + 6 * hidden

    k_emb, k_w1, k_b1, k_w2, k_b2 = jax.random.split(key, 5)
    emb_table = jax.random.normal(k_emb, (num_obj_categories, hidden),
                                  dtype=jnp.float32)
    lim1 = 1.0 / math.sqrt(feat_dim)
    w1 = jax.random.uniform(k_w1, (feat_dim, 2 * d_model), jnp.float32,
                            -lim1, lim1)
    b1 = jax.random.uniform(k_b1, (1, 2 * d_model), jnp.float32, -lim1, lim1)
    lim2 = 1.0 / math.sqrt(2 * d_model)
    w2 = jax.random.uniform(k_w2, (2 * d_model, d_model), jnp.float32,
                            -lim2, lim2)
    b2 = jax.random.uniform(k_b2, (1, d_model), jnp.float32, -lim2, lim2)

    exb = 2.0 * jnp.arange(half, dtype=jnp.float32) / hidden
    sigma = (2.0 * jnp.pi / jnp.power(0.1, exb)).reshape(1, half)

    return (emb_table, sigma, w1, b1, w2, b2)


# --------------------------------- main ------------------------------------ #
if __name__ == "__main__":
    d_model = 32
    num_obj_categories = 8

    key = jax.random.PRNGKey(0)
    k_params, k_cat, k_feat, k_cat2, k_feat2, k_cat3, k_feat3 = \
        jax.random.split(key, 7)
    raw = init_params(k_params, d_model, num_obj_categories)

    # ---- small config (B=2, N=8): single grid step, f32 and bf16 paths ---- #
    B, N = 2, 8
    cats = jax.random.randint(k_cat, (B, N, 1), 0, num_obj_categories)
    cont = jax.random.uniform(k_feat, (B, N, 6), jnp.float32, -1.0, 1.0)
    objs = jnp.concatenate([cats.astype(jnp.float32), cont], axis=-1)

    ref = object_encoder_ref(objs, raw)

    p_f32 = prepare_params(raw, d_model, use_bf16=False)
    out_f32 = jax.block_until_ready(object_encoder(objs, p_f32))
    assert out_f32.shape == (B, N, d_model)
    rref = object_encoder_restructured_ref(objs, p_f32)
    assert jnp.allclose(out_f32, rref, atol=2e-3, rtol=2e-3), "kernel mismatch"
    # Loose check vs. the original-module math (covers MXU default-precision
    # f32 matmul and the cos = sin(x + pi/2) fusion).
    assert jnp.allclose(out_f32, ref, atol=2e-2, rtol=2e-2), "f32 mismatch"

    p_bf16 = prepare_params(raw, d_model)               # bf16 default
    out_bf16 = jax.block_until_ready(object_encoder(objs, p_bf16))
    assert jnp.allclose(out_bf16, ref, atol=5e-2, rtol=5e-2), "bf16 mismatch"

    # ---- ragged config: exercises padding + explicit small tile ----------- #
    B2, N2 = 3, 100                     # M = 300 -> padded to 384, grid = 3
    cats2 = jax.random.randint(k_cat2, (B2, N2, 1), 0, num_obj_categories)
    cont2 = jax.random.uniform(k_feat2, (B2, N2, 6), jnp.float32, -1.0, 1.0)
    objs2 = jnp.concatenate([cats2.astype(jnp.float32), cont2], axis=-1)

    out2 = jax.block_until_ready(object_encoder(objs2, p_f32, tm=128))
    assert out2.shape == (B2, N2, d_model)
    rref2 = object_encoder_restructured_ref(objs2, p_f32)
    assert jnp.allclose(out2, rref2, atol=2e-3, rtol=2e-3), "tiled mismatch"

    # ---- larger config with default tm: >=2 parallel steps path ----------- #
    B3, N3 = 2, 1050                    # M = 2100 -> tm_eff 1280, grid = 2
    cats3 = jax.random.randint(k_cat3, (B3, N3, 1), 0, num_obj_categories)
    cont3 = jax.random.uniform(k_feat3, (B3, N3, 6), jnp.float32, -1.0, 1.0)
    objs3 = jnp.concatenate([cats3.astype(jnp.float32), cont3], axis=-1)

    out3 = jax.block_until_ready(object_encoder(objs3, p_f32))
    rref3 = object_encoder_restructured_ref(objs3, p_f32)
    assert jnp.allclose(out3, rref3, atol=2e-3, rtol=2e-3), "large-M mismatch"

    print("KERNEL_OK")
</pallas_src>

<mosaic_0001>
module attributes {stable_mosaic.version = 11 : i64} {
  func.func @_object_encoder_kernel(%arg0: i32, %arg1: memref<16x7xf32, #tpu.memory_space<vmem>>, %arg2: memref<1x8xf32, #tpu.memory_space<vmem>>, %arg3: memref<90x64xf32, #tpu.memory_space<vmem>>, %arg4: memref<64x32xf32, #tpu.memory_space<vmem>>, %arg5: memref<1x32xf32, #tpu.memory_space<vmem>>, %arg6: memref<16x32xf32, #tpu.memory_space<vmem>>) attributes {dimension_semantics = [#tpu.dimension_semantics<parallel>], iteration_bounds = array<i64: 1>, scalar_prefetch = 0 : i64, scratch_operands = 0 : i64, tpu.core_type = #tpu.core_type<tc>, window_params = [{transform_indices = @transform_0, window_bounds = array<i64: 16, 7>}, {pipeline_mode = #tpu.pipeline_mode<synchronous>, transform_indices = @transform_1, window_bounds = array<i64: 1, 8>}, {pipeline_mode = #tpu.pipeline_mode<synchronous>, transform_indices = @transform_2, window_bounds = array<i64: 90, 64>}, {pipeline_mode = #tpu.pipeline_mode<synchronous>, transform_indices = @transform_3, window_bounds = array<i64: 64, 32>}, {pipeline_mode = #tpu.pipeline_mode<synchronous>, transform_indices = @transform_4, window_bounds = array<i64: 1, 32>}, {transform_indices = @transform_5, window_bounds = array<i64: 16, 32>}]} {
    %c0 = arith.constant 0 : index
    %c0_0 = arith.constant 0 : index
    %0 = vector.load %arg1[%c0, %c0_0] : memref<16x7xf32, #tpu.memory_space<vmem>>, vector<16x7xf32>
    %c0_1 = arith.constant 0 : index
    %c0_2 = arith.constant 0 : index
    %1 = vector.load %arg2[%c0_1, %c0_2] : memref<1x8xf32, #tpu.memory_space<vmem>>, vector<1x8xf32>
    %2 = vector.extract_strided_slice %0 {offsets = [0, 1], sizes = [16, 1], strides = [1, 1]} : vector<16x7xf32> to vector<16x1xf32>
    %3 = vector.broadcast %2 : vector<16x1xf32> to vector<16x8xf32>
    %4 = vector.broadcast %1 : vector<1x8xf32> to vector<16x8xf32>
    %5 = arith.mulf %3, %4 : vector<16x8xf32>
    %6 = vector.extract_strided_slice %0 {offsets = [0, 2], sizes = [16, 1], strides = [1, 1]} : vector<16x7xf32> to vector<16x1xf32>
    %7 = vector.broadcast %6 : vector<16x1xf32> to vector<16x8xf32>
    %8 = vector.broadcast %1 : vector<1x8xf32> to vector<16x8xf32>
    %9 = arith.mulf %7, %8 : vector<16x8xf32>
    %10 = vector.extract_strided_slice %0 {offsets = [0, 3], sizes = [16, 1], strides = [1, 1]} : vector<16x7xf32> to vector<16x1xf32>
    %11 = vector.broadcast %10 : vector<16x1xf32> to vector<16x8xf32>
    %12 = vector.broadcast %1 : vector<1x8xf32> to vector<16x8xf32>
    %13 = arith.mulf %11, %12 : vector<16x8xf32>
    %14 = vector.extract_strided_slice %0 {offsets = [0, 4], sizes = [16, 1], strides = [1, 1]} : vector<16x7xf32> to vector<16x1xf32>
    %15 = vector.broadcast %14 : vector<16x1xf32> to vector<16x8xf32>
    %16 = vector.broadcast %1 : vector<1x8xf32> to vector<16x8xf32>
    %17 = arith.mulf %15, %16 : vector<16x8xf32>
    %18 = vector.extract_strided_slice %0 {offsets = [0, 5], sizes = [16, 1], strides = [1, 1]} : vector<16x7xf32> to vector<16x1xf32>
    %19 = vector.broadcast %18 : vector<16x1xf32> to vector<16x8xf32>
    %20 = vector.broadcast %1 : vector<1x8xf32> to vector<16x8xf32>
    %21 = arith.mulf %19, %20 : vector<16x8xf32>
    %22 = tpu.concatenate %5, %9, %13, %17, %21 in 1 : vector<16x8xf32>, vector<16x8xf32>, vector<16x8xf32>, vector<16x8xf32>, vector<16x8xf32> -> vector<16x40xf32>
    %cst = arith.constant 1.57079637 : f32
    %23 = vector.broadcast %cst : f32 to vector<16x40xf32>
    %24 = arith.addf %22, %23 : vector<16x40xf32>
    %25 = tpu.concatenate %22, %24 in 1 : vector<16x40xf32>, vector<16x40xf32> -> vector<16x80xf32>
    %26 = math.sin %25 : vector<16x80xf32>
    %27 = vector.extract_strided_slice %0 {offsets = [0, 0], sizes = [16, 1], strides = [1, 1]} : vector<16x7xf32> to vector<16x1xf32>
    %28 = arith.fptosi %27 : vector<16x1xf32> to vector<16x1xi32>
    %29 = tpu.iota {dimensions = array<i32: 1>} : vector<16x8xi32>
    %30 = vector.broadcast %28 : vector<16x1xi32> to vector<16x8xi32>
    %31 = arith.cmpi eq, %29, %30 : vector<16x8xi32>
    %32 = arith.extui %31 : vector<16x8xi1> to vector<16x8xi32>
    %33 = arith.sitofp %32 : vector<16x8xi32> to vector<16x8xf32>
    %cst_3 = arith.constant 1.000000e+00 : f32
    %34 = vector.broadcast %cst_3 : f32 to vector<16x1xf32>
    %35 = vector.extract_strided_slice %0 {offsets = [0, 6], sizes = [16, 1], strides = [1, 1]} : vector<16x7xf32> to vector<16x1xf32>
    %36 = tpu.concatenate %33, %26, %35, %34 in 1 : vector<16x8xf32>, vector<16x80xf32>, vector<16x1xf32>, vector<16x1xf32> -> vector<16x90xf32>
    %c0_4 = arith.constant 0 : index
    %c0_5 = arith.constant 0 : index
    %37 = vector.load %arg3[%c0_4, %c0_5] : memref<90x64xf32, #tpu.memory_space<vmem>>, vector<90x64xf32>
    %cst_6 = arith.constant dense<0.000000e+00> : vector<16x64xf32>
    %38 = tpu.matmul %36, %37, %cst_6 {dimension_numbers = #tpu.dot_dimension_numbers<[1], [0], [0], [1], [0, 0, 1, 1], [], []>} : vector<16x90xf32>, vector<90x64xf32>, vector<16x64xf32> -> vector<16x64xf32>
    %cst_7 = arith.constant 0.00999999977 : f32
    %39 = vector.broadcast %cst_7 : f32 to vector<16x64xf32>
    %40 = arith.mulf %39, %38 : vector<16x64xf32>
    %41 = arith.maximumf %38, %40 : vector<16x64xf32>
    %c0_8 = arith.constant 0 : index
    %c0_9 = arith.constant 0 : index
    %42 = vector.load %arg4[%c0_8, %c0_9] : memref<64x32xf32, #tpu.memory_space<vmem>>, vector<64x32xf32>
    %cst_10 = arith.constant dense<0.000000e+00> : vector<16x32xf32>
    %43 = tpu.matmul %41, %42, %cst_10 {dimension_numbers = #tpu.dot_dimension_numbers<[1], [0], [0], [1], [0, 0, 1, 1], [], []>} : vector<16x64xf32>, vector<64x32xf32>, vector<16x32xf32> -> vector<16x32xf32>
    %c0_11 = arith.constant 0 : index
    %c0_12 = arith.constant 0 : index
    %44 = vector.load %arg5[%c0_11, %c0_12] : memref<1x32xf32, #tpu.memory_space<vmem>>, vector<1x32xf32>
    %45 = vector.broadcast %44 : vector<1x32xf32> to vector<16x32xf32>
    %46 = arith.addf %43, %45 : vector<16x32xf32>
    %c0_13 = arith.constant 0 : index
    %c0_14 = arith.constant 0 : index
    %47 = vector.load %arg6[%c0_13, %c0_14] : memref<16x32xf32, #tpu.memory_space<vmem>>, vector<16x32xf32>
    tpu.vector_store %arg6[%c0_13, %c0_14], %46 {strides = array<i32>} : memref<16x32xf32, #tpu.memory_space<vmem>>, vector<16x32xf32>,
    return
  }
  func.func @transform_0(%arg0: i32) -> (i32, i32) {
    %c0_i32 = arith.constant 0 : i32
    %c0_i32_0 = arith.constant 0 : i32
    return %arg0, %c0_i32 : i32, i32
  }
  func.func @transform_1(%arg0: i32) -> (i32, i32) {
    %c0_i32 = arith.constant 0 : i32
    %c0_i32_0 = arith.constant 0 : i32
    %c0_i32_1 = arith.constant 0 : i32
    return %c0_i32, %c0_i32_0 : i32, i32
  }
  func.func @transform_2(%arg0: i32) -> (i32, i32) {
    %c0_i32 = arith.constant 0 : i32
    %c0_i32_0 = arith.constant 0 : i32
    %c0_i32_1 = arith.constant 0 : i32
    return %c0_i32, %c0_i32_0 : i32, i32
  }
  func.func @transform_3(%arg0: i32) -> (i32, i32) {
    %c0_i32 = arith.constant 0 : i32
    %c0_i32_0 = arith.constant 0 : i32
    %c0_i32_1 = arith.constant 0 : i32
    return %c0_i32, %c0_i32_0 : i32, i32
  }
  func.func @transform_4(%arg0: i32) -> (i32, i32) {
    %c0_i32 = arith.constant 0 : i32
    %c0_i32_0 = arith.constant 0 : i32
    %c0_i32_1 = arith.constant 0 : i32
    return %c0_i32, %c0_i32_0 : i32, i32
  }
  func.func @transform_5(%arg0: i32) -> (i32, i32) {
    %c0_i32 = arith.constant 0 : i32
    %c0_i32_0 = arith.constant 0 : i32
    return %arg0, %c0_i32 : i32, i32
  }
}

</mosaic_0001>

<bundles_post_ra>
// kernel: tpu_custom_call.1
= control target key start
LH: loop header
LB: loop body
LE: loop exit
PB: predicated region body
PF: predicated region fallthrough
CT: control target
= control target key end

     0   :  { %v761_v1 = vmov 3   ;;  %v762_v2 = vmov 2   ;;  %s995_s0 = inlined_call_operand.vmem [shape: f32[16,7], index: 0, kind: input, shape index: {}]   ;;  %s996_s1 = inlined_call_operand.vmem [shape: f32[1,8], index: 1, kind: input, shape index: {}]   ;;  %s997_s2 = inlined_call_operand.vmem [shape: f32[90,64], index: 2, kind: input, shape index: {}]   ;;  %s998_s3 = inlined_call_operand.vmem [shape: f32[64,32], index: 3, kind: input, shape index: {}]   ;;  %s999_s4 = inlined_call_operand.vmem [shape: f32[1,32], index: 4, kind: input, shape index: {}]   ;;  %s1000_s5 = inlined_call_operand.hbm [shape: f32[16,32], index: 5, kind: output, shape index: {}]  }
   0x1   :  { %v815_v0 = vld [vmem:[%s995_s0] sm:$0xff]  ;;  %723 = vset.pattern.permute.xlu1 %v761_v1  ;;  %722 = vset.pattern.permute.xlu0 %v762_v2 }
   0x2   :  { %10 = vsyncpa [#allocation3], 0  ;;  %53 = vperm.xlu1 %723, %v815_v0   ;;  %43 = vperm.xlu0 %722, %v815_v0   ;;  %v822_v3 = vld [vmem:[%s995_s0 + $0x8] sm:$0xff]  ;;  %v763_v4 = vmov 4   ;;  %v764_v5 = vmov 5   ;;  %v765_v6 = vmov 1   ;;  %v697_v47 = vtrunc.f32 %v815_v0 }
   0x3   :  { %v602_v7 = vld [vmem:[%s996_s1] ss:$0 sm:$0xff]  ;;  %s766_s23 = smov 8   ;;  %s767_s24 = smov 16   ;;  %vm114_vm0 = vcmask 64512   ;;  %vm117_vm1 = vcmask 130048   ;;  %v699_v46 = vtrunc.f32 %v822_v3 }
   0x4   :  { %s768_s1 = smov 24   ;;  %s769_s25 = smov 32   ;;  %vm120_vm2 = vcmask 195584   ;;  %vm123_vm3 = vcmask 261120   ;;  %v771_v48 = vmov 0   ;;  %v698_v50 = vcvt.f32.s32 %v697_v47  ;;  %v395_v52 = vld [vmem:[%s997_s2 + $0x50] sm:$0xff] }
   0x5   :  { %s770_s26 = smov 40   ;;  %v700_v49 = vcvt.f32.s32 %v699_v46  ;;  %v396_v51 = vld [vmem:[%s997_s2 + $0x58] sm:$0x3]  ;;  %vm404_vm4 = vcmask 1041408   ;;  %v394_v53 = vld [vmem:[%s997_s2 + $0x48] sm:$0xff]  ;;  %v393_v54 = vld [vmem:[%s997_s2 + $0x40] sm:$0xff] }
   0x6   :  { %57 = vperm.xlu1 %723, %v822_v3   ;;  %47 = vperm.xlu0 %722, %v822_v3   ;;  %v392_v55 = vld [vmem:[%s997_s2 + $0x38] sm:$0xff]  ;;  %v391_v56 = vld [vmem:[%s997_s2 + $0x30] sm:$0xff]  ;;  %v390_v57 = vld [vmem:[%s997_s2 + $0x28] sm:$0xff]  ;;  %vm136_vm5 = vcmask 326656   ;;  %s778_s29 = smov 82   ;;  %s780_s18 = smov [#allocation2]  }
   0x7   :  { %643 = vmatprep.subr.msk.mxu0 %vm404_vm4, %v396_v51  ;;  %v389_v58 = vld [vmem:[%s997_s2 + $0x20] sm:$0xff] }
   0x8   :  { %644 = vmatpush3.msk.msra.mxu0 %vm404_vm4, %v396_v51 }
   0x9   :  { %645 = vmatprep.subr.mxu0 %v395_v52 }
   0xa   :  { %725 = vset.pattern.permute.xlu1 %v763_v4  ;;  %724 = vset.pattern.permute.xlu0 %v763_v4 }
   0xb   :  { %67 = vperm.xlu1 %725, %v822_v3   ;;  %63 = vperm.xlu0 %724, %v815_v0  }
   0xc   :  { %646 = vmatpush3.msra.mxu0 %v395_v52 }
   0xd   :  { %647 = vmatprep.subr.mxu0 %v394_v53 }
   0xe   :  { %648 = vmatpush3.msra.mxu0 %v394_v53 }
   0xf   :  { %726 = vset.pattern.permute.xlu1 %v764_v5  ;;  %727 = vset.pattern.permute.xlu0 %v764_v5 }
  0x10   :  { %73 = vperm.xlu1 %726, %v815_v0   ;;  %77 = vperm.xlu0 %727, %v822_v3  }
  0x11   :  { %649 = vmatprep.subr.mxu0 %v393_v54 }
  0x12   :  { %650 = vmatpush3.msra.mxu0 %v393_v54 }
  0x13   :  { %651 = vmatprep.subr.mxu0 %v392_v55 }
  0x14   :  { %728 = vset.pattern.permute.xlu1 %v765_v6  ;;  %729 = vset.pattern.permute.xlu0 %v771_v48 }
  0x15   :  { %26 = vperm.xlu1 %728, %v815_v0   ;;  %652 = vmatpush3.msra.mxu0 %v392_v55 }
  0x16   :  { %653 = vmatprep.subr.mxu0 %v391_v56 }
  0x17   :  { %654 = vmatpush3.msra.mxu0 %v391_v56 }
  0x18   :  { %655 = vmatprep.subr.mxu0 %v390_v57 }
  0x19   :  { %31 = vperm.xlu1 %728, %v822_v3   ;;  %656 = vmatpush3.msra.mxu0 %v390_v57 }
  0x1a   :  { %657 = vmatprep.subr.mxu0 %v389_v58 }
  0x1b   :  { %658 = vmatpush3.msra.mxu0 %v389_v58 }
  0x1d   :  { %730 = vset.pattern.permute.xlu1 %v771_v48 }
  0x7d   :  { %v54_v8 = vpop.permute.xlu1 %53  ;;  %v44_v9 = vpop.permute.xlu0 %43 }
  0x7e   :  { %v50_v10 = vmul.f32 %v602_v7, %v44_v9  ;;  %v60_v12 = vmul.f32 %v602_v7, %v54_v8 }
  0x80   :  { %84 = vrot.lane.b32.xlu0 %v50_v10, %s766_s23 }
  0x81   :  { %v48_v11 = vpop.permute.xlu0 %47  ;;  %v58_v13 = vpop.permute.xlu1 %57 }
  0x82   :  { %v51_v14 = vmul.f32 %v602_v7, %v48_v11  ;;  %v61_v15 = vmul.f32 %v602_v7, %v58_v13 }
  0x84   :  { %92 = vrot.lane.b32.xlu0 %v60_v12, %s767_s24  ;;  %86 = vrot.lane.b32.xlu1 %v51_v14, %s766_s23 }
  0x86   :  { %v64_v16 = vpop.permute.xlu0 %63  ;;  %v68_v17 = vpop.permute.xlu1 %67 }
  0x87   :  { %v70_v18 = vmul.f32 %v602_v7, %v64_v16  ;;  %v71_v19 = vmul.f32 %v602_v7, %v68_v17 }
  0x88   :  { %94 = vrot.lane.b32.xlu1 %v61_v15, %s767_s24 }
  0x89   :  { %100 = vrot.lane.b32.xlu0 %v70_v18, %s768_s1 }
  0x8b   :  { %v74_v20 = vpop.permute.xlu1 %73  ;;  %v78_v21 = vpop.permute.xlu0 %77 }
  0x8c   :  { %v80_v22 = vmul.f32 %v602_v7, %v74_v20  ;;  %102 = vrot.lane.b32.xlu1 %v71_v19, %s768_s1  ;;  %v81_v23 = vmul.f32 %v602_v7, %v78_v21  ;;  %v772_v19 = vmov 683565275  }
  0x8e   :  { %108 = vrot.lane.b32.xlu0 %v80_v22, %s769_s25  ;;  %v773_v22 = vmov 2475754826  }
  0x90   :  { %110 = vrot.lane.b32.xlu1 %v81_v23, %s769_s25  ;;  %v27_v24 = vpop.permute.xlu1 %26 }
  0x91   :  { %v40_v31 = vmul.f32 %v602_v7, %v27_v24  ;;  %v774_v24 = vmov 2131351028  }
  0x94   :  { %v32_v25 = vpop.permute.xlu1 %31 }
  0x95   :  { %v41_v32 = vmul.f32 %v602_v7, %v32_v25 }
  0xf2   :  { %v85_v26 = vpop.permute.xlu0 %84 }
  0xf3   :  { %v115_v33 = vsel %vm114_vm0, %v40_v31, %v85_v26  ;;  %v775_v26 = vmov 2102212464  }
  0xf6   :  { %v87_v27 = vpop.permute.xlu1 %86  ;;  %v93_v28 = vpop.permute.xlu0 %92 }
  0xf7   :  { %v118_v35 = vsel %vm117_vm1, %v115_v33, %v93_v28  ;;  %v116_v36 = vsel %vm114_vm0, %v41_v32, %v87_v27  ;;  %v776_v28 = vmov 920167782  }
  0xfa   :  { %v95_v29 = vpop.permute.xlu1 %94 }
  0xfb   :  { %v101_v30 = vpop.permute.xlu0 %100  ;;  %v119_v39 = vsel %vm117_vm1, %v116_v36, %v95_v29 }
  0xfc   :  { %v121_v37 = vsel %vm120_vm2, %v118_v35, %v101_v30  ;;  %v777_v35 = vmov 1326507024  }
  0xfe   :  { %v103_v34 = vpop.permute.xlu1 %102 }
  0xff   :  { %v122_v41 = vsel %vm120_vm2, %v119_v39, %v103_v34 }
 0x100   :  { %v109_v38 = vpop.permute.xlu0 %108 }
 0x101   :  { %v124_v40 = vsel %vm123_vm3, %v121_v37, %v109_v38 }
 0x102   :  { %v126_v42 = vadd.f32 1.5707964, %v124_v40  ;;  %v111_v43 = vpop.permute.xlu1 %110 }
 0x103   :  { %v125_v44 = vsel %vm123_vm3, %v122_v41, %v111_v43 }
 0x104   :  { %v127_v45 = vadd.f32 1.5707964, %v125_v44  ;;  %130 = vrot.lane.b32.xlu0 %v126_v42, %s770_s26 }
 0x106   :  { %132 = vrot.lane.b32.xlu1 %v127_v45, %s770_s26 }
 0x108   :  { %352 = vperm.xlu0 %729, %v698_v50  }
 0x10a   :  { %355 = vperm.xlu1 %730, %v700_v49  }
 0x176   :  { %v131_v59 = vpop.permute.xlu0 %130 }
 0x177   :  { %v867_v60 = vsel %vm136_vm5, %v124_v40, %v131_v59 }
 0x178   :  { %v139_v61 = vand.u32 2147483647, %v867_v60  ;;  %v142_v62 = vand.u32 2139095040, %v867_v60  ;;  %v133_v63 = vpop.permute.xlu1 %132 }
 0x179   :  { %v871_v1 = vsel %vm136_vm5, %v125_v44, %v133_v63 }
 0x17a   :  { %v143_v2 = vshrl.u32 %v142_v62, 23  ;;  %v146_v4 = vand.u32 8388607, %v139_v61  ;;  %v246_v5 = vand.u32 2139095040, %v871_v1  ;;  %v243_v7 = vand.u32 2147483647, %v871_v1 }
 0x17c   :  { %v603_v6 = vadd.s32 4294967169, %v143_v2  ;;  %v247_v8 = vshrl.u32 %v246_v5, 23  ;;  %v147_v10 = vor.u32 8388608, %v146_v4  ;;  %v250_v12 = vand.u32 8388607, %v243_v7 }
 0x17e   :  { %v149_v9 = vadd.s32 1, %v603_v6  ;;  %v607_v11 = vadd.s32 4294967169, %v247_v8  ;;  %v879_v17 = vshll.u32 %v147_v10, 8  ;;  %v251_v21 = vor.u32 8388608, %v250_v12 }
 0x180   :  { %vm150_vm6 = vcmp.gt.s32.totalorder %v149_v9, 0  ;;  %v253_v14 = vadd.s32 1, %v607_v11  ;;  %v291_v54 = vshll.u32 %v251_v21, 8 }
 0x181   :  { %v151_v13 = vsel %vm150_vm6, %v149_v9, 0  ;;  %vm141_vm6 = vcmp.lt.s32.totalorder %v867_v60, 0 }
 0x182   :  { %v152_v15 = vshrl.u32 %v151_v13, 5  ;;  %v153_v16 = vand.u32 31, %v151_v13  ;;  %vm254_vm7 = vcmp.gt.s32.totalorder %v253_v14, 0 }
 0x183   :  { %v255_v40 = vsel %vm254_vm7, %v253_v14, 0  ;;  %vm921_vm7 = vcmp.le.f32.partialorder %v139_v61, 0.7853982 }
 0x184   :  { %v154_v18 = vsub.s32 32, %v153_v16  ;;  %v156_v20 = vshll.u32 %v772_v19, %v153_v16  ;;  %v159_v23 = vshll.u32 %v773_v22, %v153_v16  ;;  %v162_v25 = vshll.u32 %v774_v24, %v153_v16 }
 0x185   :  { %v165_v27 = vshll.u32 %v775_v26, %v153_v16  ;;  %v168_v29 = vshll.u32 %v776_v28, %v153_v16  ;;  %vm171_vm8 = vcmp.lt.s32.totalorder %v152_v15, 1  ;;  %vm173_vm9 = vcmp.lt.s32.totalorder %v152_v15, 3 }
 0x186   :  { %v157_v30 = vshrl.u32 %v773_v22, %v154_v18  ;;  %v160_v31 = vshrl.u32 %v774_v24, %v154_v18  ;;  %v163_v32 = vshrl.u32 %v775_v26, %v154_v18  ;;  %v155_v33 = vshrl.u32 %v772_v19, %v154_v18 }
 0x187   :  { %v166_v34 = vshrl.u32 %v776_v28, %v154_v18  ;;  %v169_v36 = vshrl.u32 %v777_v35, %v154_v18  ;;  %vm174_vm10 = vcmp.lt.s32.totalorder %v152_v15, 4  ;;  %v257_v43 = vand.u32 31, %v255_v40 }
 0x188   :  { %v158_v37 = vor.u32 %v157_v30, %v156_v20  ;;  %v161_v38 = vor.u32 %v160_v31, %v159_v23  ;;  %v164_v39 = vor.u32 %v163_v32, %v162_v25  ;;  %vm172_vm11 = vcmp.lt.s32.totalorder %v152_v15, 2 }
 0x189   :  { %v167_v41 = vor.u32 %v166_v34, %v165_v27  ;;  %v170_v42 = vor.u32 %v169_v36, %v168_v29  ;;  %v258_v51 = vsub.s32 32, %v257_v43  ;;  %v256_v58 = vshrl.u32 %v255_v40, 5 }
 0x18a   :  { %v175_v44 = vsel %vm171_vm8, %v155_v33, %v158_v37  ;;  %v176_v45 = vsel %vm174_vm10, %v164_v39, 2102212464  ;;  %v179_v46 = vsel %vm171_vm8, %v158_v37, %v161_v38  ;;  %v183_v47 = vsel %vm171_vm8, %v161_v38, %v164_v39 }
 0x18b   :  { %v177_v48 = vsel %vm173_vm9, %v161_v38, %v176_v45  ;;  %v180_v49 = vsel %vm174_vm10, %v167_v41, 920167782  ;;  %v184_v50 = vsel %vm174_vm10, %v170_v42, 1326507024  ;;  %v260_v4 = vshll.u32 %v772_v19, %v257_v43 }
 0x18c   :  { %v181_v52 = vsel %vm173_vm9, %v164_v39, %v180_v49  ;;  %v185_v53 = vsel %vm173_vm9, %v167_v41, %v184_v50  ;;  %v178_v55 = vsel %vm172_vm11, %v175_v44, %v177_v48  ;;  %v261_v5 = vshrl.u32 %v773_v22, %v258_v51 }
 0x18d   :  { %v182_v56 = vsel %vm172_vm11, %v179_v46, %v181_v52  ;;  %v186_v57 = vsel %vm172_vm11, %v183_v47, %v185_v53  ;;  %v263_v6 = vshll.u32 %v773_v22, %v257_v43  ;;  %v264_v8 = vshrl.u32 %v774_v24, %v258_v51 }
 0x18e   :  { %v891_v59 = vmul.u32.u64.low %v879_v17, %v186_v57  ;;  %v892_v62 = vmul.u32.u64.high %v879_v17, %v186_v57, %v891_v59  ;;  %v895_v63 = vmul.u32.u64.low %v879_v17, %v182_v56  ;;  %v896_v2 = vmul.u32.u64.high %v879_v17, %v182_v56, %v895_v63 }
 0x18f   :  { %v266_v9 = vshll.u32 %v774_v24, %v257_v43  ;;  %v267_v10 = vshrl.u32 %v775_v26, %v258_v51  ;;  %v269_v11 = vshll.u32 %v775_v26, %v257_v43  ;;  %v270_v12 = vshrl.u32 %v776_v28, %v258_v51 }
 0x190   :  { %v262_v13 = vor.u32 %v261_v5, %v260_v4  ;;  %v265_v14 = vor.u32 %v264_v8, %v263_v6  ;;  %v272_v15 = vshll.u32 %v776_v28, %v257_v43  ;;  %v273_v16 = vshrl.u32 %v777_v35, %v258_v51 }
 0x191   :  { %v194_v18 = vmul.u32 %v879_v17, %v178_v55  ;;  %vm196_vm12 = vc.u32 %v892_v62, %v895_v63  ;;  %v197_v20 = vadd.s32 1, %v896_v2  ;;  %v268_v21 = vor.u32 %v267_v10, %v266_v9 }
 0x192   :  { %v259_v23 = vshrl.u32 %v772_v19, %v258_v51  ;;  %v271_v22 = vor.u32 %v270_v12, %v269_v11  ;;  %v274_v25 = vor.u32 %v273_v16, %v272_v15  ;;  %vm275_vm13 = vcmp.lt.s32.totalorder %v256_v58, 1 }
 0x193   :  { %v198_v24 = vsel %vm196_vm12, %v197_v20, %v896_v2  ;;  %vm277_vm14 = vcmp.lt.s32.totalorder %v256_v58, 3  ;;  %vm278_vm15 = vcmp.lt.s32.totalorder %v256_v58, 4  ;;  %v283_v26 = vsel %vm275_vm13, %v262_v13, %v265_v14 }
 0x194   :  { %v199_v27 = vadd.s32 %v198_v24, %v194_v18  ;;  %v280_v28 = vsel %vm278_vm15, %v268_v21, 2102212464  ;;  %v284_v29 = vsel %vm278_vm15, %v271_v22, 920167782  ;;  %v287_v17 = vsel %vm275_vm13, %v265_v14, %v268_v21 }
 0x195   :  { %vm276_vm1 = vcmp.lt.s32.totalorder %v256_v58, 2  ;;  %v279_v30 = vsel %vm275_vm13, %v259_v23, %v262_v13  ;;  %v285_v31 = vsel %vm277_vm14, %v268_v21, %v284_v29  ;;  %v288_v32 = vsel %vm278_vm15, %v274_v25, 1326507024 }
 0x196   :  { %v200_v33 = vadd.s32 536870912, %v199_v27  ;;  %v281_v34 = vsel %vm277_vm14, %v265_v14, %v280_v28  ;;  %v286_v35 = vsel %vm276_vm1, %v283_v26, %v285_v31  ;;  %v289_v19 = vsel %vm277_vm14, %v271_v22, %v288_v32 }
 0x197   :  { %v290_v36 = vsel %vm276_vm1, %v287_v17, %v289_v19  ;;  %v906_v37 = vmul.u32.u64.low %v291_v54, %v286_v35  ;;  %v907_v38 = vmul.u32.u64.high %v291_v54, %v286_v35, %v906_v37  ;;  %v282_v42 = vsel %vm276_vm1, %v279_v30, %v281_v34 }
 0x198   :  { %v201_v39 = vshrl.u32 %v200_v33, 30  ;;  %v909_v40 = vmul.u32.u64.low %v291_v54, %v290_v36  ;;  %v910_v41 = vmul.u32.u64.high %v291_v54, %v290_v36, %v909_v40  ;;  %v298_v46 = vmul.u32 %v291_v54, %v282_v42 }
 0x199   :  { %v301_v44 = vadd.s32 1, %v907_v38  ;;  %v195_v59 = vadd.s32 %v895_v63, %v892_v62  ;;  %vm245_vm8 = vcmp.lt.s32.totalorder %v871_v1, 0  ;;  %vm936_vm9 = vcmp.le.f32.partialorder %v243_v7, 0.7853982 }
 0x19a   :  { %v202_v43 = vshll.u32 %v201_v39, 30  ;;  %vm300_vm2 = vc.u32 %v910_v41, %v906_v37  ;;  %v299_v21 = vadd.s32 %v906_v37, %v910_v41  ;;  %v225_v26 = vsub.s32 4, %v201_v39 }
 0x19b   :  { %v302_v47 = vsel %vm300_vm2, %v301_v44, %v907_v38  ;;  %v388_v38 = vld [vmem:[%s997_s2 + $0x18] sm:$0xff]  ;;  %vm231_vm13 = vweird.f32 %v867_v60  ;;  %vm335_vm2 = vweird.f32 %v871_v1 }
 0x19c   :  { %v203_v45 = vsub.s32 %v199_v27, %v202_v43  ;;  %v303_v49 = vadd.s32 %v302_v47, %v298_v46  ;;  %v226_v32 = vsel %vm141_vm6, %v225_v26, %v201_v39  ;;  %659 = vmatprep.subr.mxu0 %v388_v38  ;;  %v490_v26 = vld [vmem:[%s998_s3 + $0x18] sm:$0xff]  ;;  %v489_v27 = vld [vmem:[%s998_s3 + $0x10] sm:$0xff] }
 0x19d   :  { %v228_v61 = vsel %vm921_vm7, 0, %v226_v32  ;;  %660 = vmatpush3.msra.mxu0 %v388_v38 }
 0x19e   :  { %v205_v48 = vsub.s32 0, %v203_v45  ;;  %v304_v51 = vadd.s32 536870912, %v303_v49  ;;  %v232_v37 = vadd.s32 3, %v228_v61 }
 0x1a0   :  { %v604_v50 = vmin.u32 %v205_v48, %v203_v45  ;;  %v305_v53 = vshrl.u32 %v304_v51, 30  ;;  %v233_v43 = vand.u32 3, %v232_v37  ;;  %v387_v51 = vld [vmem:[%s997_s2 + $0x10] sm:$0xff] }
 0x1a1   :  { %661 = vmatprep.subr.mxu0 %v387_v51 }
 0x1a2   :  { %v207_v52 = vclz %v604_v50  ;;  %v306_v56 = vshll.u32 %v305_v53, 30  ;;  %v329_v36 = vsub.s32 4, %v305_v53  ;;  %vm238_vm10 = vcmp.eq.s32.totalorder %v233_v43, 2  ;;  %662 = vmatpush3.msra.mxu0 %v387_v51 }
 0x1a3   :  { %vm235_vm11 = vcmp.eq.s32.totalorder %v233_v43, 0  ;;  %vm234_vm12 = vcmp.lt.s32.totalorder %v233_v43, 2 }
 0x1a4   :  { %v605_v55 = vadd.s32 4294967294, %v207_v52  ;;  %v307_v57 = vsub.s32 %v303_v49, %v306_v56  ;;  %v330_v42 = vsel %vm245_vm8, %v329_v36, %v305_v53  ;;  %v386_v52 = vld [vmem:[%s997_s2 + $0x8] sm:$0xff] }
 0x1a5   :  { %v332_v7 = vsel %vm936_vm9, 0, %v330_v42  ;;  %663 = vmatprep.subr.mxu0 %v386_v52 }
 0x1a6   :  { %vm606_vm4 = vcmp.lt.s32.totalorder %v605_v55, 0  ;;  %v309_v4 = vsub.s32 0, %v307_v57  ;;  %v336_v50 = vadd.s32 3, %v332_v7  ;;  %664 = vmatpush3.msra.mxu0 %v386_v52 }
 0x1a7   :  { %v210_v58 = vsel %vm606_vm4, 0, %v605_v55 }
 0x1a8   :  { %v211_v2 = vsub.s32 32, %v210_v58  ;;  %v215_v54 = vsub.s32 4294967266, %v210_v58  ;;  %v212_v5 = vshll.u32 %v203_v45, %v210_v58  ;;  %v608_v9 = vmin.u32 %v309_v4, %v307_v57 }
 0x1a9   :  { %v337_v56 = vand.u32 3, %v336_v50 }
 0x1aa   :  { %v213_v6 = vshrl.u32 %v195_v59, %v211_v2  ;;  %v216_v8 = vadd.s32 127, %v215_v54  ;;  %v311_v12 = vclz %v608_v9  ;;  %v493_v59 = vld [vmem:[%s998_s3 + $0x30] sm:$0xff]  ;;  %v491_v9 = vld [vmem:[%s998_s3 + $0x20] sm:$0xff] }
 0x1ab   :  { %vm342_vm14 = vcmp.eq.s32.totalorder %v337_v56, 2  ;;  %vm339_vm15 = vcmp.eq.s32.totalorder %v337_v56, 0  ;;  %vm338_vm1 = vcmp.lt.s32.totalorder %v337_v56, 2 }
 0x1ac   :  { %v214_v10 = vor.u32 %v213_v6, %v212_v5  ;;  %v217_v11 = vshll.u32 %v216_v8, 23  ;;  %v609_v14 = vadd.s32 4294967294, %v311_v12  ;;  %v492_v5 = vld [vmem:[%s998_s3 + $0x28] sm:$0xff] }
 0x1ae   :  { %v218_v13 = vor.u32 4788187, %v217_v11  ;;  %v221_v16 = vcvt.s32.f32 %v214_v10  ;;  %vm610_vm5 = vcmp.lt.s32.totalorder %v609_v14, 0  ;;  %v349_v11 = vlaneseq }
 0x1af   :  { %v314_v18 = vsel %vm610_vm5, 0, %v609_v14  ;;  %v353_v14 = vpop.permute.xlu0 %352  ;;  %vm379_vm5 = vcmask 719872  }
 0x1b0   :  { %v219_v15 = vand.u32 2147483647, %v218_v13  ;;  %v315_v62 = vsub.s32 32, %v314_v18  ;;  %v319_v63 = vsub.s32 4294967266, %v314_v18  ;;  %v316_v22 = vshll.u32 %v307_v57, %v314_v18  ;;  %v385_v57 = vld [vmem:[%s997_s2] sm:$0xff]  ;;  %v356_v13 = vpop.permute.xlu1 %355 }
 0x1b1   :  { %665 = vmatprep.subr.mxu0 %v385_v57  ;;  %v350_v12 = vand.u32 127, %v349_v11 }
 0x1b2   :  { %v222_v20 = vmul.f32 %v221_v16, %v219_v15  ;;  %v317_v25 = vshrl.u32 %v299_v21, %v315_v62  ;;  %v320_v24 = vadd.s32 127, %v319_v63  ;;  %666 = vmatpush3.msra.mxu0 %v385_v57  ;;  %v779_v16 = vmov 0.0  }
 0x1b3   :  { %vm357_vm4 = vcmp.eq.s32.totalorder %v350_v12, %v353_v14 }
 0x1b4   :  { %v223_v23 = vxor.u32 2147483648, %v222_v20  ;;  %v318_v29 = vor.u32 %v317_v25, %v316_v22  ;;  %v321_v17 = vshll.u32 %v320_v24, 23  ;;  %v611_v18 = vsel %vm357_vm4, 1.0, %v779_v16 }
 0x1b6   :  { %v224_v28 = vsel %vm141_vm6, %v223_v23, %v222_v20  ;;  %v322_v31 = vor.u32 4788187, %v321_v17  ;;  %v325_v34 = vcvt.s32.f32 %v318_v29  ;;  %vm382_vm6 = vcmask 728064   ;;  %v487_v29 = vld [vmem:[%s998_s3] sm:$0xff] }
 0x1b7   :  { %v227_v30 = vsel %vm921_vm7, %v867_v60, %v224_v28  ;;  %v494_v60 = vld [vmem:[%s998_s3 + $0x38] sm:$0xff]  ;;  %vm397_vm7 = vcmask 736256   ;;  %v488_v28 = vld [vmem:[%s998_s3 + $0x8] sm:$0xff]  ;;  %s591_s3 = sshll.u32 %s780_s18, 4  ;;  %s592_s3 = int_to_ptr.vmem [resolvable:$true] %s591_s3 }
 0x1b8   :  { %731 = vcosq.f32 %v227_v30  ;;  %v323_v33 = vand.u32 2147483647, %v322_v31  ;;  %670 = vmatprep.subr.mxu1 %v494_v60  ;;  %s739_s19 = scalar_lea.vmem %s592_s3, 256  ;;  %p744_p1 = scmp.lt.s32.totalorder %s592_s3, %s592_s3 }
 0x1b9   :  { %733 = vsinq.f32 %v227_v30  ;;  %671 = vmatpush3.msra.mxu1 %v494_v60  ;;  %p740_p0 = scmp.ne.s32.totalorder %s592_s3, %s739_s19  ;;  %p745_p2 = scmp.lt.s32.totalorder %s739_s19, %s739_s19 }
 0x1ba   :  { %v326_v35 = vmul.f32 %v325_v34, %v323_v33  ;;  %672 = vmatprep.subr.mxu1 %v493_v59 }
 0x1bb   :  { %673 = vmatpush3.msra.mxu1 %v493_v59  ;;  %p746_p3 = por %p745_p2, %p744_p1 }
 0x1bc   :  { %v327_v19 = vxor.u32 2147483648, %v326_v35  ;;  %674 = vmatprep.subr.mxu1 %v492_v5 }
 0x1bd   :  { %675 = vmatpush3.msra.mxu1 %v492_v5  ;;  %p747_p4 = pnand %p746_p3, %p740_p0 }
 0x1be   :  { %v328_v40 = vsel %vm245_vm8, %v327_v19, %v326_v35  ;;  %676 = vmatprep.subr.mxu1 %v491_v9  ;;  %vm358_vm8 = vcmp.eq.s32.totalorder %v350_v12, %v356_v13  ;;  %v616_v35 = vld [vmem:[%s999_s4] ss:$0 sm:$0xff] }
 0x1bf   :  { %v331_v41 = vsel %vm936_vm9, %v871_v1, %v328_v40  ;;  %677 = vmatpush3.msra.mxu1 %v491_v9 }
 0x1c0   :  { %735 = vcosq.f32 %v331_v41  ;;  %678 = vmatprep.subr.mxu1 %v490_v26 }
 0x1c1   :  { %737 = vsinq.f32 %v331_v41  ;;  %679 = vmatpush3.msra.mxu1 %v490_v26 }
 0x1c2   :  { %680 = vmatprep.subr.mxu1 %v489_v27 }
 0x1c3   :  { %681 = vmatpush3.msra.mxu1 %v489_v27 }
 0x1c4   :  { %682 = vmatprep.subr.mxu1 %v488_v28 }
 0x1c5   :  { %v732_v44 = vpop.eup %731  ;;  %683 = vmatpush3.msra.mxu1 %v488_v28 }
 0x1c6   :  { %v734_v45 = vpop.eup %733  ;;  %v239_v46 = vxor.u32 2147483648, %v732_v44  ;;  %684 = vmatprep.subr.mxu1 %v487_v29 }
 0x1c7   :  { %v236_v47 = vxor.u32 2147483648, %v734_v45  ;;  %685 = vmatpush3.msra.mxu1 %v487_v29 }
 0x1c8   :  { %v240_v48 = vsel %vm238_vm10, %v239_v46, %v734_v45 }
 0x1c9   :  { %v237_v49 = vsel %vm235_vm11, %v732_v44, %v236_v47 }
 0x1ca   :  { %v241_v53 = vsel %vm234_vm12, %v237_v49, %v240_v48 }
 0x1cb   :  { %v242_v55 = vsel %vm231_vm13, nan, %v241_v53 }
 0x1cc   :  { %365 = vrot.lane.b32.xlu1 %v242_v55, %s766_s23 }
 0x1cd   :  { %v736_v58 = vpop.eup %735 }
 0x1ce   :  { %v738_v2 = vpop.eup %737  ;;  %v343_v54 = vxor.u32 2147483648, %v736_v58 }
 0x1cf   :  { %v340_v4 = vxor.u32 2147483648, %v738_v2 }
 0x1d0   :  { %371 = vrot.lane.b32.xlu1 %v815_v0, %s778_s29  ;;  %v344_v6 = vsel %vm342_vm14, %v343_v54, %v738_v2 }
 0x1d1   :  { %v341_v8 = vsel %vm339_vm15, %v736_v58, %v340_v4 }
 0x1d2   :  { %v345_v0 = vsel %vm338_vm1, %v341_v8, %v344_v6 }
 0x1d3   :  { %v346_v10 = vsel %vm335_vm2, nan, %v345_v0 }
 0x1d4   :  { %367 = vrot.lane.b32.xlu0 %v346_v10, %s766_s23 }
 0x1d8   :  { %373 = vrot.lane.b32.xlu0 %v822_v3, %s778_s29  ;;  %v612_v3 = vsel %vm358_vm8, 1.0, %v779_v16 }
 0x23e   :  { %v366_v15 = vpop.permute.xlu1 %365 }
 0x23f   :  { %v377_v1 = vsel %vm114_vm0, %v611_v18, %v366_v15 }
 0x242   :  { %v372_v20 = vpop.permute.xlu1 %371 }
 0x243   :  { %v380_v21 = vsel %vm379_vm5, %v377_v1, %v372_v20 }
 0x244   :  { %v383_v62 = vsel %vm382_vm6, %v380_v21, 1.0 }
 0x245   :  { %667 = vmatprep.mubr.msk.f32.mxu0 %vm397_vm7, %v383_v62 }
 0x246   :  { %v368_v63 = vpop.permute.xlu0 %367 }
 0x247   :  { %v378_v23 = vsel %vm114_vm0, %v612_v3, %v368_v63  ;;  %vm502_vm0 = vcmask 523264  }
 0x24a   :  { %v374_v22 = vpop.permute.xlu0 %373 }
 0x24b   :  { %v381_v25 = vsel %vm379_vm5, %v378_v23, %v374_v22 }
 0x24c   :  { %v384_v24 = vsel %vm382_vm6, %v381_v25, 1.0 }
 0x24d   :  { %668 = vmatmul.mubr.msk.f32.vlgmr.msra.gmra.mxu0 %vm397_vm7, %v384_v24 }
 0x30d   :  { %v669_v17 = vpop.f32.mrf.mxu0 }
 0x30e   :  { %v484_v30 = vmul.f32 0.01, %v669_v17 }
 0x30f   :  { %v474_v31 = vpop.f32.mrf.mxu0 }
 0x310   :  { %v483_v32 = vmul.f32 0.01, %v474_v31  ;;  %v486_v34 = vmax.f32 %v669_v17, %v484_v30 }
 0x312   :  { %v485_v33 = vmax.f32 %v474_v31, %v483_v32 }
 0x314   :  { %686 = vmatprep.mubr.msk.f32.mxu1 %vm502_vm0, %v485_v33 }
 0x315   :  { %687 = vmatmul.mubr.msk.f32.vlgmr.msra.gmra.mxu1 %vm502_vm0, %v486_v34 }
 0x3d5   :  { %v688_v61 = vpop.f32.mrf.mxu1 }
 0x3d6   :  { %v581_v19 = vadd.f32 %v688_v61, %v616_v35 }
 0x3d7   :  { %v575_v36 = vpop.f32.mrf.mxu1 }
 0x3d8   :  { %585 = vst.msk [vmem:[#allocation2 + $0x8] sm:$0xff] %vm123_vm3, %v581_v19  ;;  %v576_v37 = vadd.f32 %v616_v35, %v575_v36 }
 0x3da   :  { %584 = vst.msk [vmem:[#allocation2] sm:$0xff] %vm123_vm3, %v576_v37 }
 0x3db   :  { %750 = shalt.err (!%p747_p4)
}
 0x3dc   :  { %s781_s20 = smov 128  }
 0x3dd   :  { %597 = dma.vmem_to_hbm [thread:$0]  %s592_s3, 256, %s1000_s5, [#allocation3], %s781_s20, %s781_s20, %s766_s23  }
 0x3de   :  { %759 = dma.done.wait [#allocation3], 256  }
 0x3df   :  { %760 = vsyncadd [#allocation3], 4294967040 }
 0x3e0   :  { %601 = vsyncpa [#allocation3], 1 }

</bundles_post_ra>
